<compile_context>
chip_gen: v5e
topology: v5e:2x2
jax: 0.10.0
libtpu: 0.0.40
codegen_flags: <defaults>
</compile_context>

<pallas_src>
import functools

import jax
import jax.numpy as jnp
from jax.experimental import pallas as pl
from jax.experimental.pallas import tpu as pltpu

IN_F = 784
HID = 128
OUT_F = 10
OUT_PAD = 128  # lane-dense padded width of the second linear


def _mlp_kernel(x_ref, w0_ref, b0_ref, w1_ref, b1_ref, o_ref):
    # hidden = relu(x @ W0 + b0): bf16 operands on the MXU, f32 accumulate,
    # bias-add / ReLU in f32.
    h = jnp.dot(x_ref[...], w0_ref[...], preferred_element_type=jnp.float32)
    h = jnp.maximum(h + b0_ref[...], 0.0)                  # (TB,128) + (1,128)
    # out = h @ W1p + b1p on the zero-padded, lane-dense (128,128) weight.
    y = jnp.dot(h.astype(jnp.bfloat16), w1_ref[...],
                preferred_element_type=jnp.float32)
    o_ref[...] = (y + b1_ref[...]).astype(o_ref.dtype)     # (TB,128) + (1,128)


def _round_up(n, m):
    return (n + m - 1) // m * m


@functools.partial(jax.jit, static_argnames=("tb_max",))
def mlp_forward(x, w0, b0, w1, b1, tb_max=512):
    """x: (B, 784) f32; w0: (784,128); b0: (128,); w1: (128,10); b1: (10,)."""
    B = x.shape[0]

    # Batch tile: multiple of 8 sublanes, as large as reasonable (<= tb_max) so
    # the MXU row dimension is well filled and DMA tiles are big. Fits easily in
    # the 32 MiB scoped-VMEM default even on v7x (64 MiB physical).
    tb = min(tb_max, _round_up(B, 8))
    b_pad = _round_up(B, tb)

    # bf16 operands for the MXU; halves x/W HBM traffic.
    x_bf = x.astype(jnp.bfloat16)
    if b_pad != B:
        x_bf = jnp.pad(x_bf, ((0, b_pad - B), (0, 0)))
    w0_bf = w0.astype(jnp.bfloat16)
    b0_row = b0.reshape(1, HID).astype(jnp.float32)

    # Lane-pad the second linear to 128 output columns (zero-pad -> identical
    # math in the first 10 columns).
    w1_bf = jnp.zeros((HID, OUT_PAD), jnp.bfloat16).at[:, :OUT_F].set(
        w1.astype(jnp.bfloat16))
    b1_row = jnp.zeros((1, OUT_PAD), jnp.float32).at[:, :OUT_F].set(
        b1.reshape(1, OUT_F).astype(jnp.float32))

    grid = (b_pad // tb,)

    flops = 2 * b_pad * IN_F * HID + 2 * b_pad * HID * OUT_PAD
    bytes_accessed = (
        x_bf.size * 2 + w0_bf.size * 2 + w1_bf.size * 2
        + b0_row.size * 4 + b1_row.size * 4 + b_pad * OUT_PAD * 4)

    out = pl.pallas_call(
        _mlp_kernel,
        out_shape=jax.ShapeDtypeStruct((b_pad, OUT_PAD), jnp.float32),
        grid_spec=pltpu.PrefetchScalarGridSpec(
            num_scalar_prefetch=0,
            grid=grid,
            in_specs=[
                pl.BlockSpec((tb, IN_F), lambda i: (i, 0)),     # x: tiled over batch
                pl.BlockSpec((IN_F, HID), lambda i: (0, 0)),    # W0: resident
                pl.BlockSpec((1, HID), lambda i: (0, 0)),       # b0: resident
                pl.BlockSpec((HID, OUT_PAD), lambda i: (0, 0)),  # W1p: resident
                pl.BlockSpec((1, OUT_PAD), lambda i: (0, 0)),   # b1p: resident
            ],
            out_specs=pl.BlockSpec((tb, OUT_PAD), lambda i: (i, 0)),
        ),
        compiler_params=pltpu.CompilerParams(
            dimension_semantics=("parallel",),
            vmem_limit_bytes=64 * 1024 * 1024,
        ),
        cost_estimate=pl.CostEstimate(
            flops=flops, transcendentals=0, bytes_accessed=bytes_accessed),
    )(x_bf, w0_bf, b0_row, w1_bf, b1_row)

    y = out[:B, :OUT_F]
    # PyTorch forward returns (x, x): the same tensor twice.
    return y, y


def init_params(key):
    # Deterministic synthetic init mimicking nn.Linear's U(-1/sqrt(fan_in), 1/sqrt(fan_in)).
    k0, k1, k2, k3 = jax.random.split(key, 4)
    bound0 = 1.0 / jnp.sqrt(784.0)
    bound1 = 1.0 / jnp.sqrt(128.0)
    w0 = jax.random.uniform(k0, (IN_F, HID), jnp.float32, -bound0, bound0)  # (in, out)
    b0 = jax.random.uniform(k1, (HID,), jnp.float32, -bound0, bound0)
    w1 = jax.random.uniform(k2, (HID, OUT_F), jnp.float32, -bound1, bound1)  # (in, out)
    b1 = jax.random.uniform(k3, (OUT_F,), jnp.float32, -bound1, bound1)
    return w0, b0, w1, b1


if __name__ == "__main__":
    key = jax.random.PRNGKey(0)
    kx, kp = jax.random.split(key)
    batch = 8
    x = jax.random.normal(kx, (batch, IN_F), jnp.float32)
    w0, b0, w1, b1 = init_params(kp)

    y0, y1 = mlp_forward(x, w0, b0, w1, b1)
    jax.block_until_ready((y0, y1))

    # Reference check in plain JAX (f32). Kernel uses bf16 MXU operands with
    # f32 accumulation, so use a loosened tolerance.
    ref = jnp.maximum(x @ w0 + b0[None, :], 0.0) @ w1 + b1[None, :]
    assert y0.shape == (batch, OUT_F)
    assert y1.shape == (batch, OUT_F)
    assert jnp.allclose(y0, ref, atol=2e-2, rtol=2e-2)
    assert jnp.allclose(y1, ref, atol=2e-2, rtol=2e-2)
    print("KERNEL_OK")
</pallas_src>

<mosaic_0001>
module attributes {stable_mosaic.version = 11 : i64} {
  func.func @_mlp_kernel(%arg0: i32, %arg1: memref<8x784xbf16, #tpu.memory_space<vmem>>, %arg2: memref<784x128xbf16, #tpu.memory_space<vmem>>, %arg3: memref<1x128xf32, #tpu.memory_space<vmem>>, %arg4: memref<128x128xbf16, #tpu.memory_space<vmem>>, %arg5: memref<1x128xf32, #tpu.memory_space<vmem>>, %arg6: memref<8x128xf32, #tpu.memory_space<vmem>>) attributes {dimension_semantics = [#tpu.dimension_semantics<parallel>], iteration_bounds = array<i64: 1>, scalar_prefetch = 0 : i64, scratch_operands = 0 : i64, tpu.core_type = #tpu.core_type<tc>, window_params = [{transform_indices = @transform_0, window_bounds = array<i64: 8, 784>}, {pipeline_mode = #tpu.pipeline_mode<synchronous>, transform_indices = @transform_1, window_bounds = array<i64: 784, 128>}, {pipeline_mode = #tpu.pipeline_mode<synchronous>, transform_indices = @transform_2, window_bounds = array<i64: 1, 128>}, {pipeline_mode = #tpu.pipeline_mode<synchronous>, transform_indices = @transform_3, window_bounds = array<i64: 128, 128>}, {pipeline_mode = #tpu.pipeline_mode<synchronous>, transform_indices = @transform_4, window_bounds = array<i64: 1, 128>}, {transform_indices = @transform_5, window_bounds = array<i64: 8, 128>}]} {
    %c0 = arith.constant 0 : index
    %c0_0 = arith.constant 0 : index
    %0 = vector.load %arg1[%c0, %c0_0] : memref<8x784xbf16, #tpu.memory_space<vmem>>, vector<8x784xbf16>
    %c0_1 = arith.constant 0 : index
    %c0_2 = arith.constant 0 : index
    %1 = vector.load %arg2[%c0_1, %c0_2] : memref<784x128xbf16, #tpu.memory_space<vmem>>, vector<784x128xbf16>
    %cst = arith.constant dense<0.000000e+00> : vector<8x128xf32>
    %2 = tpu.matmul %0, %1, %cst {dimension_numbers = #tpu.dot_dimension_numbers<[1], [0], [0], [1], [0, 0, 1, 1], [], []>} : vector<8x784xbf16>, vector<784x128xbf16>, vector<8x128xf32> -> vector<8x128xf32>
    %c0_3 = arith.constant 0 : index
    %c0_4 = arith.constant 0 : index
    %3 = vector.load %arg3[%c0_3, %c0_4] : memref<1x128xf32, #tpu.memory_space<vmem>>, vector<1x128xf32>
    %4 = vector.broadcast %3 : vector<1x128xf32> to vector<8x128xf32>
    %5 = arith.addf %2, %4 : vector<8x128xf32>
    %cst_5 = arith.constant 0.000000e+00 : f32
    %6 = vector.broadcast %cst_5 : f32 to vector<8x128xf32>
    %7 = arith.maximumf %5, %6 : vector<8x128xf32>
    %8 = arith.truncf %7 : vector<8x128xf32> to vector<8x128xbf16>
    %c0_6 = arith.constant 0 : index
    %c0_7 = arith.constant 0 : index
    %9 = vector.load %arg4[%c0_6, %c0_7] : memref<128x128xbf16, #tpu.memory_space<vmem>>, vector<128x128xbf16>
    %cst_8 = arith.constant dense<0.000000e+00> : vector<8x128xf32>
    %10 = tpu.matmul %8, %9, %cst_8 {dimension_numbers = #tpu.dot_dimension_numbers<[1], [0], [0], [1], [0, 0, 1, 1], [], []>} : vector<8x128xbf16>, vector<128x128xbf16>, vector<8x128xf32> -> vector<8x128xf32>
    %c0_9 = arith.constant 0 : index
    %c0_10 = arith.constant 0 : index
    %11 = vector.load %arg5[%c0_9, %c0_10] : memref<1x128xf32, #tpu.memory_space<vmem>>, vector<1x128xf32>
    %12 = vector.broadcast %11 : vector<1x128xf32> to vector<8x128xf32>
    %13 = arith.addf %10, %12 : vector<8x128xf32>
    %c0_11 = arith.constant 0 : index
    %c0_12 = arith.constant 0 : index
    %14 = vector.load %arg6[%c0_11, %c0_12] : memref<8x128xf32, #tpu.memory_space<vmem>>, vector<8x128xf32>
    tpu.vector_store %arg6[%c0_11, %c0_12], %13 {strides = array<i32>} : memref<8x128xf32, #tpu.memory_space<vmem>>, vector<8x128xf32>,
    return
  }
  func.func @transform_0(%arg0: i32) -> (i32, i32) {
    %c0_i32 = arith.constant 0 : i32
    %c0_i32_0 = arith.constant 0 : i32
    return %arg0, %c0_i32 : i32, i32
  }
  func.func @transform_1(%arg0: i32) -> (i32, i32) {
    %c0_i32 = arith.constant 0 : i32
    %c0_i32_0 = arith.constant 0 : i32
    %c0_i32_1 = arith.constant 0 : i32
    return %c0_i32, %c0_i32_0 : i32, i32
  }
  func.func @transform_2(%arg0: i32) -> (i32, i32) {
    %c0_i32 = arith.constant 0 : i32
    %c0_i32_0 = arith.constant 0 : i32
    %c0_i32_1 = arith.constant 0 : i32
    return %c0_i32, %c0_i32_0 : i32, i32
  }
  func.func @transform_3(%arg0: i32) -> (i32, i32) {
    %c0_i32 = arith.constant 0 : i32
    %c0_i32_0 = arith.constant 0 : i32
    %c0_i32_1 = arith.constant 0 : i32
    return %c0_i32, %c0_i32_0 : i32, i32
  }
  func.func @transform_4(%arg0: i32) -> (i32, i32) {
    %c0_i32 = arith.constant 0 : i32
    %c0_i32_0 = arith.constant 0 : i32
    %c0_i32_1 = arith.constant 0 : i32
    return %c0_i32, %c0_i32_0 : i32, i32
  }
  func.func @transform_5(%arg0: i32) -> (i32, i32) {
    %c0_i32 = arith.constant 0 : i32
    %c0_i32_0 = arith.constant 0 : i32
    return %arg0, %c0_i32 : i32, i32
  }
}

</mosaic_0001>

<bundles_post_ra>
// kernel: mlp_forward.1
= control target key start
LH: loop header
LB: loop body
LE: loop exit
PB: predicated region body
PF: predicated region fallthrough
CT: control target
= control target key end

     0   :  { %vm445_vm0 = vcmask 130048   ;;  %s1138_s1 = inlined_call_operand.vmem [shape: bf16[784,128], index: 1, kind: input, shape index: {}]   ;;  %s1139_s2 = inlined_call_operand.vmem [shape: f32[1,128], index: 2, kind: input, shape index: {}]   ;;  %s1140_s0 = inlined_call_operand.vmem [shape: bf16[8,784], index: 0, kind: input, shape index: {}]   ;;  %s1141_s4 = inlined_call_operand.vmem [shape: f32[1,128], index: 4, kind: input, shape index: {}]   ;;  %s1142_s3 = inlined_call_operand.vmem [shape: bf16[128,128], index: 3, kind: input, shape index: {}]   ;;  %s1143_s5 = inlined_call_operand.vmem [shape: f32[8,128], index: 5, kind: output, shape index: {}]  }
   0x1   :  { %v864_v0 = vld [vmem:[%s1138_s1 + $0x38] sm:$0xff]  ;;  %v863_v3 = vld [vmem:[%s1138_s1 + $0x30] sm:$0xff]  ;;  %v862_v8 = vld [vmem:[%s1138_s1 + $0x28] sm:$0xff] }
   0x2   :  { %v872_v1 = vld [vmem:[%s1138_s1 + $0x78] sm:$0xff]  ;;  %449 = vmatpush.bf16.msra.mxu0 %v864_v0  ;;  %v871_v4 = vld [vmem:[%s1138_s1 + $0x70] sm:$0xff]  ;;  %v870_v9 = vld [vmem:[%s1138_s1 + $0x68] sm:$0xff] }
   0x3   :  { %v880_v2 = vld [vmem:[%s1138_s1 + $0xb8] sm:$0xff]  ;;  %462 = vmatpush.bf16.msra.mxu1 %v872_v1  ;;  %v879_v5 = vld [vmem:[%s1138_s1 + $0xb0] sm:$0xff]  ;;  %v878_v10 = vld [vmem:[%s1138_s1 + $0xa8] sm:$0xff] }
   0x4   :  { %475 = vmatpush.bf16.msra.mxu2 %v880_v2  ;;  %v888_v6 = vld [vmem:[%s1138_s1 + $0xf8] sm:$0xff]  ;;  %v887_v7 = vld [vmem:[%s1138_s1 + $0xf0] sm:$0xff]  ;;  %v886_v11 = vld [vmem:[%s1138_s1 + $0xe8] sm:$0xff] }
   0x5   :  { %488 = vmatpush.bf16.msra.mxu3 %v888_v6  ;;  %v861_v12 = vld [vmem:[%s1138_s1 + $0x20] sm:$0xff]  ;;  %v860_v16 = vld [vmem:[%s1138_s1 + $0x18] sm:$0xff]  ;;  %v859_v20 = vld [vmem:[%s1138_s1 + $0x10] sm:$0xff] }
   0x6   :  { %450 = vmatpush.bf16.msra.mxu0 %v863_v3  ;;  %v869_v13 = vld [vmem:[%s1138_s1 + $0x60] sm:$0xff]  ;;  %v868_v17 = vld [vmem:[%s1138_s1 + $0x58] sm:$0xff]  ;;  %v867_v21 = vld [vmem:[%s1138_s1 + $0x50] sm:$0xff] }
   0x7   :  { %463 = vmatpush.bf16.msra.mxu1 %v871_v4  ;;  %v877_v14 = vld [vmem:[%s1138_s1 + $0xa0] sm:$0xff]  ;;  %v876_v18 = vld [vmem:[%s1138_s1 + $0x98] sm:$0xff]  ;;  %v875_v22 = vld [vmem:[%s1138_s1 + $0x90] sm:$0xff] }
   0x8   :  { %476 = vmatpush.bf16.msra.mxu2 %v879_v5  ;;  %v885_v15 = vld [vmem:[%s1138_s1 + $0xe0] sm:$0xff]  ;;  %v884_v19 = vld [vmem:[%s1138_s1 + $0xd8] sm:$0xff]  ;;  %v883_v23 = vld [vmem:[%s1138_s1 + $0xd0] sm:$0xff] }
   0x9   :  { %489 = vmatpush.bf16.msra.mxu3 %v887_v7  ;;  %v858_v24 = vld [vmem:[%s1138_s1 + $0x8] sm:$0xff]  ;;  %v21_v26 = vld [vmem:[%s1140_s0] sm:$0xff]  ;;  %v896_v34 = vld [vmem:[%s1138_s1 + $0x138] sm:$0xff] }
   0xa   :  { %451 = vmatpush.bf16.msra.mxu0 %v862_v8  ;;  %v866_v25 = vld [vmem:[%s1138_s1 + $0x48] sm:$0xff]  ;;  %v131_v29 = vunpack.c.l.b16 %v21_v26  ;;  %v132_v31 = vunpack.c.h.b16 %v21_v26  ;;  %v857_v32 = vld [vmem:[%s1138_s1] sm:$0xff]  ;;  %v904_v35 = vld [vmem:[%s1138_s1 + $0x178] sm:$0xff] }
   0xb   :  { %464 = vmatpush.bf16.msra.mxu1 %v870_v9  ;;  %v874_v27 = vld [vmem:[%s1138_s1 + $0x88] sm:$0xff]  ;;  %v865_v33 = vld [vmem:[%s1138_s1 + $0x40] sm:$0xff]  ;;  %v895_v43 = vld [vmem:[%s1138_s1 + $0x130] sm:$0xff] }
   0xc   :  { %477 = vmatpush.bf16.msra.mxu2 %v878_v10  ;;  %v22_v28 = vld [vmem:[%s1140_s0 + $0x8] sm:$0xff]  ;;  %v873_v36 = vld [vmem:[%s1138_s1 + $0x80] sm:$0xff]  ;;  %v138_v38 = vpack.c.b16 %v131_v29, %v131_v29  ;;  %v139_v39 = vpack.c.b16 %v132_v31, %v132_v31  ;;  %v903_v44 = vld [vmem:[%s1138_s1 + $0x170] sm:$0xff] }
   0xd   :  { %490 = vmatpush.bf16.msra.mxu3 %v886_v11  ;;  %v882_v30 = vld [vmem:[%s1138_s1 + $0xc8] sm:$0xff]  ;;  %v133_v37 = vunpack.c.l.b16 %v22_v28  ;;  %v134_v40 = vunpack.c.h.b16 %v22_v28  ;;  %v881_v41 = vld [vmem:[%s1138_s1 + $0xc0] sm:$0xff]  ;;  %v24_v51 = vld [vmem:[%s1140_s0 + $0x18] sm:$0xf] }
   0xe   :  { %452 = vmatpush.bf16.msra.mxu0 %v861_v12  ;;  %v905_v42 = vld [vmem:[%s1138_s1 + $0x180] sm:$0xff]  ;;  %v894_v47 = vld [vmem:[%s1138_s1 + $0x128] sm:$0xff]  ;;  %v892_v52 = vld [vmem:[%s1138_s1 + $0x118] sm:$0xff]  ;;  %v137_v54 = vunpack.c.l.b16 %v24_v51 }
   0xf   :  { %465 = vmatpush.bf16.msra.mxu1 %v869_v13  ;;  %v140_v45 = vpack.c.b16 %v133_v37, %v133_v37  ;;  %v141_v46 = vpack.c.b16 %v134_v40, %v134_v40  ;;  %v902_v48 = vld [vmem:[%s1138_s1 + $0x168] sm:$0xff]  ;;  %v893_v49 = vld [vmem:[%s1138_s1 + $0x120] sm:$0xff]  ;;  %v900_v53 = vld [vmem:[%s1138_s1 + $0x158] sm:$0xff] }
  0x10   :  { %478 = vmatpush.bf16.msra.mxu2 %v877_v14  ;;  %v901_v50 = vld [vmem:[%s1138_s1 + $0x160] sm:$0xff]  ;;  %v891_v55 = vld [vmem:[%s1138_s1 + $0x110] sm:$0xff]  ;;  %v144_v57 = vpack.c.b16 %v137_v54, %v137_v54  ;;  %v890_v58 = vld [vmem:[%s1138_s1 + $0x108] sm:$0xff] }
  0x11   :  { %491 = vmatpush.bf16.msra.mxu3 %v885_v15  ;;  %v899_v56 = vld [vmem:[%s1138_s1 + $0x150] sm:$0xff]  ;;  %v898_v59 = vld [vmem:[%s1138_s1 + $0x148] sm:$0xff]  ;;  %v889_v63 = vld [vmem:[%s1138_s1 + $0x100] sm:$0xff] }
  0x12   :  { %453 = vmatpush.bf16.msra.mxu0 %v860_v16  ;;  %v23_v60 = vld [vmem:[%s1140_s0 + $0x10] sm:$0xff]  ;;  %v897_v0 = vld [vmem:[%s1138_s1 + $0x140] sm:$0xff]  ;;  %v913_v3 = vld [vmem:[%s1142_s3 + $0x38] sm:$0xff] }
  0x13   :  { %466 = vmatpush.bf16.msra.mxu1 %v868_v17  ;;  %v135_v61 = vunpack.c.l.b16 %v23_v60  ;;  %v136_v62 = vunpack.c.h.b16 %v23_v60  ;;  %v912_v4 = vld [vmem:[%s1142_s3 + $0x30] sm:$0xff]  ;;  %v911_v5 = vld [vmem:[%s1142_s3 + $0x28] sm:$0xff]  ;;  %v910_v6 = vld [vmem:[%s1142_s3 + $0x20] sm:$0xff] }
  0x14   :  { %479 = vmatpush.bf16.msra.mxu2 %v876_v18  ;;  %v909_v7 = vld [vmem:[%s1142_s3 + $0x18] sm:$0xff]  ;;  %v908_v8 = vld [vmem:[%s1142_s3 + $0x10] sm:$0xff]  ;;  %v907_v9 = vld [vmem:[%s1142_s3 + $0x8] sm:$0xff] }
  0x15   :  { %492 = vmatpush.bf16.msra.mxu3 %v884_v19  ;;  %v142_v1 = vpack.c.b16 %v135_v61, %v135_v61  ;;  %v143_v2 = vpack.c.b16 %v136_v62, %v136_v62  ;;  %v906_v12 = vld [vmem:[%s1142_s3] sm:$0xff] }
  0x16   :  { %454 = vmatpush.bf16.msra.mxu0 %v859_v20  ;;  %v914_v17 = vld [vmem:[%s1139_s2] ss:$0 sm:$0xff] }
  0x17   :  { %467 = vmatpush.bf16.msra.mxu1 %v867_v21 }
  0x18   :  { %480 = vmatpush.bf16.msra.mxu2 %v875_v22 }
  0x19   :  { %493 = vmatpush.bf16.msra.mxu3 %v883_v23 }
  0x1a   :  { %455 = vmatpush.bf16.msra.mxu0 %v858_v24 }
  0x1b   :  { %468 = vmatpush.bf16.msra.mxu1 %v866_v25 }
  0x1c   :  { %481 = vmatpush.bf16.msra.mxu2 %v874_v27 }
  0x1d   :  { %494 = vmatpush.bf16.msra.mxu3 %v882_v30 }
  0x1e   :  { %456 = vmatpush.bf16.msra.mxu0 %v857_v32 }
  0x1f   :  { %469 = vmatpush.bf16.msra.mxu1 %v865_v33 }
  0x20   :  { %482 = vmatpush.bf16.msra.mxu2 %v873_v36 }
  0x21   :  { %457 = vmatmul.bf16.vlgmr.msra.gmra.mxu0 %v138_v38  ;;  %495 = vmatpush.bf16.msra.mxu3 %v881_v41 }
  0x22   :  { %501 = vmatpush.bf16.msrb.mxu0 %v896_v34  ;;  %470 = vmatmul.bf16.vlgmr.msra.gmra.mxu1 %v139_v39 }
  0x23   :  { %514 = vmatpush.bf16.msrb.mxu1 %v904_v35  ;;  %483 = vmatmul.bf16.vlgmr.msra.gmra.mxu2 %v140_v45  ;;  %v915_v35 = vld [vmem:[%s1141_s4] ss:$0 sm:$0xff] }
  0x24   :  { %534 = vmatpush.bf16.msrb.mxu2 %v905_v42  ;;  %496 = vmatmul.bf16.vlgmr.msra.gmra.mxu3 %v141_v46 }
  0x25   :  { %610 = vmatpush.bf16.msrb.mxu3 %v913_v3 }
  0x26   :  { %502 = vmatpush.bf16.msrb.mxu0 %v895_v43 }
  0x27   :  { %515 = vmatpush.bf16.msrb.mxu1 %v903_v44 }
  0x29   :  { %611 = vmatpush.bf16.msrb.mxu3 %v912_v4 }
  0x2a   :  { %503 = vmatpush.bf16.msrb.mxu0 %v894_v47 }
  0x2b   :  { %516 = vmatpush.bf16.msrb.mxu1 %v902_v48 }
  0x2d   :  { %612 = vmatpush.bf16.msrb.mxu3 %v911_v5 }
  0x2e   :  { %504 = vmatpush.bf16.msrb.mxu0 %v893_v49 }
  0x2f   :  { %517 = vmatpush.bf16.msrb.mxu1 %v901_v50 }
  0x31   :  { %613 = vmatpush.bf16.msrb.mxu3 %v910_v6 }
  0x32   :  { %505 = vmatpush.bf16.msrb.mxu0 %v892_v52 }
  0x33   :  { %518 = vmatpush.bf16.msrb.mxu1 %v900_v53  ;;  %824 = vmatmul.msk.bf16.vlgmr.msrb.gmra.mxu2 %vm445_vm0, %v144_v57 }
  0x35   :  { %614 = vmatpush.bf16.msrb.mxu3 %v909_v7 }
  0x36   :  { %506 = vmatpush.bf16.msrb.mxu0 %v891_v55 }
  0x37   :  { %519 = vmatpush.bf16.msrb.mxu1 %v899_v56 }
  0x39   :  { %615 = vmatpush.bf16.msrb.mxu3 %v908_v8 }
  0x3a   :  { %507 = vmatpush.bf16.msrb.mxu0 %v890_v58 }
  0x3b   :  { %520 = vmatpush.bf16.msrb.mxu1 %v898_v59 }
  0x3d   :  { %616 = vmatpush.bf16.msrb.mxu3 %v907_v9 }
  0x3e   :  { %508 = vmatpush.bf16.msrb.mxu0 %v889_v63 }
  0x3f   :  { %521 = vmatpush.bf16.msrb.mxu1 %v897_v0 }
  0x41   :  { %509 = vmatmul.bf16.vlgmr.msrb.gmra.mxu0 %v142_v1  ;;  %617 = vmatpush.bf16.msrb.mxu3 %v906_v12 }
  0x42   :  { %522 = vmatmul.bf16.vlgmr.msrb.gmra.mxu1 %v143_v2 }
  0x9e   :  { %v458_v10 = vpop.f32.mrf.mxu0 }
  0x9f   :  { %v471_v11 = vpop.f32.mrf.mxu1  ;;  %v459_v18 = vadd.f32 %v914_v17, %v458_v10 }
  0xa1   :  { %v472_v21 = vadd.f32 %v471_v11, %v459_v18 }
  0xa6   :  { %v460_v13 = vpop.f32.mrf.mxu0  ;;  %v484_v15 = vpop.f32.mrf.mxu2 }
  0xa7   :  { %v473_v14 = vpop.f32.mrf.mxu1  ;;  %v497_v16 = vpop.f32.mrf.mxu3  ;;  %v485_v22 = vadd.f32 %v484_v15, %v472_v21 }
  0xa9   :  { %v498_v24 = vadd.f32 %v497_v16, %v485_v22 }
  0xae   :  { %v486_v19 = vpop.f32.mrf.mxu2 }
  0xaf   :  { %v499_v20 = vpop.f32.mrf.mxu3 }
  0xb6   :  { %v536_v23 = vpop.f32.mrf.mxu2 }
  0xbe   :  { %v510_v25 = vpop.f32.mrf.mxu0  ;;  %v538_v29 = vpop.f32.mrf.mxu2 }
  0xbf   :  { %v523_v26 = vpop.f32.mrf.mxu1  ;;  %v511_v27 = vadd.f32 %v510_v25, %v498_v24 }
  0xc1   :  { %v524_v28 = vadd.f32 %v523_v26, %v511_v27 }
  0xc3   :  { %v537_v30 = vadd.f32 %v536_v23, %v524_v28 }
  0xc5   :  { %v540_v31 = vmax.f32 %v537_v30, 0.0 }
  0xc6   :  { %v512_v32 = vpop.f32.mrf.mxu0 }
  0xc7   :  { %v525_v33 = vpop.f32.mrf.mxu1  ;;  %v541_v34 = vpack.c.bf16 %v540_v31, %v540_v31 }
  0xc9   :  { %618 = vmatmul.bf16.vlgmr.msrb.gmra.mxu3 %v541_v34 }
 0x14c   :  { %v619_v36 = vpop.f32.mrf.mxu3 }
 0x14d   :  { %v620_v37 = vadd.f32 %v915_v35, %v619_v36 }
 0x14f   :  { %623 = vst [vmem:[%s1143_s5] sm:$0xff] %v620_v37 }
 0x154   :  { %v621_v38 = vpop.f32.mrf.mxu3 }

</bundles_post_ra>
